<compile_context>
chip_gen: v7x
topology: tpu7x:2x2x1
jax: 0.10.0
libtpu: 0.0.40
codegen_flags: <defaults>
</compile_context>

<pallas_src>
import functools
import math

import jax
import jax.numpy as jnp
from jax.experimental import pallas as pl
from jax.experimental.pallas import tpu as pltpu

_HALF_LOG_2PI = 0.5 * math.log(2.0 * math.pi)


def _softplus(z):
    # numerically stable softplus: max(z, 0) + log1p(exp(-|z|))
    return jnp.maximum(z, 0.0) + jnp.log1p(jnp.exp(-jnp.abs(z)))


def actor_kernel(x_ref, w1_ref, b1_ref, wh_ref, bh_ref, eps_ref, out_ref, *,
                 action_dim, action_bound):
    x = x_ref[...]

    # fc1 + ReLU
    h = jnp.dot(x, w1_ref[...], preferred_element_type=jnp.float32) + b1_ref[...]
    h = jnp.maximum(h, 0.0)

    # fused heads: one (hidden, 2A) matmul, then slice mu / pre-softplus z
    heads = jnp.dot(h, wh_ref[...], preferred_element_type=jnp.float32) + bh_ref[...]
    mu = heads[:, :action_dim]
    z = heads[:, action_dim:]
    std = _softplus(z)

    # reparameterized sample: Normal(mu, std).rsample() = mu + eps * std
    eps = eps_ref[...]
    sample = mu + eps * std

    # Normal(mu, std).log_prob(sample); (sample - mu)/std == eps exactly
    log_prob = -0.5 * jnp.square(eps) - jnp.log(std) - _HALF_LOG_2PI

    # tanh squash; the PyTorch reference applies tanh to `action` AGAIN inside
    # the correction term (tanh(tanh(sample))) -- reproduced exactly.
    a = jnp.tanh(sample)
    log_prob = log_prob - jnp.log(1.0 - jnp.square(jnp.tanh(a)) + 1e-7)

    # single lane-dense store: [ action*bound | log_prob ]
    out_ref[...] = jnp.concatenate(
        [(a * action_bound).astype(out_ref.dtype),
         log_prob.astype(out_ref.dtype)], axis=-1)


def _round_up(n, m):
    return ((n + m - 1) // m) * m


def actor_forward(x, params, eps, action_bound):
    B, state_dim = x.shape
    hidden_dim = params["w1"].shape[1]
    A = params["w_mu"].shape[1]

    # wrapper-side head fusion (free): (hidden, 2A) weight, (1, 2A) bias
    w_heads = jnp.concatenate([params["w_mu"], params["w_std"]], axis=1)
    b_heads = jnp.concatenate([params["b_mu"], params["b_std"]], axis=1)

    # batch tile: multiple of 8 sublanes, capped so double-buffered tiles fit
    # comfortably within v7x's 32 MiB scoped VMEM default.
    TB = min(512, _round_up(B, 8))
    B_pad = _round_up(B, TB)
    if B_pad != B:
        x = jnp.pad(x, ((0, B_pad - B), (0, 0)))
        eps = jnp.pad(eps, ((0, B_pad - B), (0, 0)))

    kernel = functools.partial(actor_kernel, action_dim=A,
                               action_bound=float(action_bound))

    out = pl.pallas_call(
        kernel,
        out_shape=jax.ShapeDtypeStruct((B_pad, 2 * A), jnp.float32),
        grid=(pl.cdiv(B_pad, TB),),
        in_specs=[
            pl.BlockSpec((TB, state_dim), lambda i: (i, 0)),        # x (blocked)
            pl.BlockSpec((state_dim, hidden_dim), lambda i: (0, 0)),  # w1 (resident)
            pl.BlockSpec((1, hidden_dim), lambda i: (0, 0)),          # b1 (resident)
            pl.BlockSpec((hidden_dim, 2 * A), lambda i: (0, 0)),      # w_heads (resident)
            pl.BlockSpec((1, 2 * A), lambda i: (0, 0)),               # b_heads (resident)
            pl.BlockSpec((TB, A), lambda i: (i, 0)),                  # eps (blocked)
        ],
        out_specs=pl.BlockSpec((TB, 2 * A), lambda i: (i, 0)),
        compiler_params=pltpu.CompilerParams(
            dimension_semantics=("parallel",)),
    )(x, params["w1"], params["b1"], w_heads, b_heads, eps)

    action = out[:B, :A]
    log_prob = out[:B, A:]
    return action, log_prob


def init_params(key, state_dim, hidden_dim, action_dim):
    # PyTorch Linear default init: U(-1/sqrt(fan_in), 1/sqrt(fan_in));
    # weights stored transposed (in, out) so the kernel does x @ W + b.
    def lin(k, fan_in, fan_out):
        kw, kb = jax.random.split(k)
        bound = 1.0 / math.sqrt(fan_in)
        w = jax.random.uniform(kw, (fan_in, fan_out), jnp.float32, -bound, bound)
        b = jax.random.uniform(kb, (1, fan_out), jnp.float32, -bound, bound)
        return w, b

    k1, k2, k3 = jax.random.split(key, 3)
    w1, b1 = lin(k1, state_dim, hidden_dim)
    w_mu, b_mu = lin(k2, hidden_dim, action_dim)
    w_std, b_std = lin(k3, hidden_dim, action_dim)
    return {"w1": w1, "b1": b1, "w_mu": w_mu, "b_mu": b_mu,
            "w_std": w_std, "b_std": b_std}


def _reference(x, p, eps, action_bound):
    h = jnp.maximum(x @ p["w1"] + p["b1"], 0.0)
    mu = h @ p["w_mu"] + p["b_mu"]
    std = jax.nn.softplus(h @ p["w_std"] + p["b_std"])
    s = mu + eps * std
    lp = -0.5 * jnp.square((s - mu) / std) - jnp.log(std) - _HALF_LOG_2PI
    a = jnp.tanh(s)
    lp = lp - jnp.log(1.0 - jnp.square(jnp.tanh(a)) + 1e-7)
    return a * action_bound, lp


if __name__ == "__main__":
    batch, state_dim, hidden_dim, action_dim = 8, 16, 32, 8
    action_bound = 1.0

    key = jax.random.PRNGKey(0)
    k_param, k_x, k_eps = jax.random.split(key, 3)

    params = init_params(k_param, state_dim, hidden_dim, action_dim)
    x = jax.random.normal(k_x, (batch, state_dim), jnp.float32)
    # rsample noise eps ~ N(0,1); generated deterministically outside the kernel.
    eps = jax.random.normal(k_eps, (batch, action_dim), jnp.float32)

    action, log_prob = actor_forward(x, params, eps, action_bound)
    jax.block_until_ready((action, log_prob))

    ref_action, ref_log_prob = _reference(x, params, eps, action_bound)
    assert jnp.allclose(action, ref_action, atol=1e-5, rtol=1e-5)
    assert jnp.allclose(log_prob, ref_log_prob, atol=1e-5, rtol=1e-5)

    print("KERNEL_OK")
</pallas_src>

<mosaic_0001>
module attributes {stable_mosaic.version = 11 : i64} {
  func.func @actor_kernel(%arg0: i32, %arg1: memref<8x16xf32, #tpu.memory_space<vmem>>, %arg2: memref<16x32xf32, #tpu.memory_space<vmem>>, %arg3: memref<1x32xf32, #tpu.memory_space<vmem>>, %arg4: memref<32x16xf32, #tpu.memory_space<vmem>>, %arg5: memref<1x16xf32, #tpu.memory_space<vmem>>, %arg6: memref<8x8xf32, #tpu.memory_space<vmem>>, %arg7: memref<8x16xf32, #tpu.memory_space<vmem>>) attributes {dimension_semantics = [#tpu.dimension_semantics<parallel>], iteration_bounds = array<i64: 1>, scalar_prefetch = 0 : i64, scratch_operands = 0 : i64, tpu.core_type = #tpu.core_type<tc>, window_params = [{transform_indices = @transform_0, window_bounds = array<i64: 8, 16>}, {pipeline_mode = #tpu.pipeline_mode<synchronous>, transform_indices = @transform_1, window_bounds = array<i64: 16, 32>}, {pipeline_mode = #tpu.pipeline_mode<synchronous>, transform_indices = @transform_2, window_bounds = array<i64: 1, 32>}, {pipeline_mode = #tpu.pipeline_mode<synchronous>, transform_indices = @transform_3, window_bounds = array<i64: 32, 16>}, {pipeline_mode = #tpu.pipeline_mode<synchronous>, transform_indices = @transform_4, window_bounds = array<i64: 1, 16>}, {transform_indices = @transform_5, window_bounds = array<i64: 8, 8>}, {transform_indices = @transform_6, window_bounds = array<i64: 8, 16>}]} {
    %c0 = arith.constant 0 : index
    %c0_0 = arith.constant 0 : index
    %0 = vector.load %arg1[%c0, %c0_0] : memref<8x16xf32, #tpu.memory_space<vmem>>, vector<8x16xf32>
    %c0_1 = arith.constant 0 : index
    %c0_2 = arith.constant 0 : index
    %1 = vector.load %arg2[%c0_1, %c0_2] : memref<16x32xf32, #tpu.memory_space<vmem>>, vector<16x32xf32>
    %cst = arith.constant dense<0.000000e+00> : vector<8x32xf32>
    %2 = tpu.matmul %0, %1, %cst {dimension_numbers = #tpu.dot_dimension_numbers<[1], [0], [0], [1], [0, 0, 1, 1], [], []>} : vector<8x16xf32>, vector<16x32xf32>, vector<8x32xf32> -> vector<8x32xf32>
    %c0_3 = arith.constant 0 : index
    %c0_4 = arith.constant 0 : index
    %3 = vector.load %arg3[%c0_3, %c0_4] : memref<1x32xf32, #tpu.memory_space<vmem>>, vector<1x32xf32>
    %4 = vector.broadcast %3 : vector<1x32xf32> to vector<8x32xf32>
    %5 = arith.addf %2, %4 : vector<8x32xf32>
    %cst_5 = arith.constant 0.000000e+00 : f32
    %6 = vector.broadcast %cst_5 : f32 to vector<8x32xf32>
    %7 = arith.maximumf %5, %6 : vector<8x32xf32>
    %c0_6 = arith.constant 0 : index
    %c0_7 = arith.constant 0 : index
    %8 = vector.load %arg4[%c0_6, %c0_7] : memref<32x16xf32, #tpu.memory_space<vmem>>, vector<32x16xf32>
    %cst_8 = arith.constant dense<0.000000e+00> : vector<8x16xf32>
    %9 = tpu.matmul %7, %8, %cst_8 {dimension_numbers = #tpu.dot_dimension_numbers<[1], [0], [0], [1], [0, 0, 1, 1], [], []>} : vector<8x32xf32>, vector<32x16xf32>, vector<8x16xf32> -> vector<8x16xf32>
    %c0_9 = arith.constant 0 : index
    %c0_10 = arith.constant 0 : index
    %10 = vector.load %arg5[%c0_9, %c0_10] : memref<1x16xf32, #tpu.memory_space<vmem>>, vector<1x16xf32>
    %11 = vector.broadcast %10 : vector<1x16xf32> to vector<8x16xf32>
    %12 = arith.addf %9, %11 : vector<8x16xf32>
    %13 = vector.extract_strided_slice %12 {offsets = [0, 0], sizes = [8, 8], strides = [1, 1]} : vector<8x16xf32> to vector<8x8xf32>
    %14 = vector.extract_strided_slice %12 {offsets = [0, 8], sizes = [8, 8], strides = [1, 1]} : vector<8x16xf32> to vector<8x8xf32>
    %cst_11 = arith.constant 0.000000e+00 : f32
    %15 = vector.broadcast %cst_11 : f32 to vector<8x8xf32>
    %16 = arith.maximumf %14, %15 : vector<8x8xf32>
    %17 = math.absf %14 : vector<8x8xf32>
    %cst_12 = arith.constant 0.000000e+00 : f32
    %18 = vector.broadcast %cst_12 : f32 to vector<8x8xf32>
    %19 = arith.subf %18, %17 : vector<8x8xf32>
    %20 = math.exp %19 : vector<8x8xf32>
    %21 = math.log1p %20 : vector<8x8xf32>
    %22 = arith.addf %16, %21 : vector<8x8xf32>
    %c0_13 = arith.constant 0 : index
    %c0_14 = arith.constant 0 : index
    %23 = vector.load %arg6[%c0_13, %c0_14] : memref<8x8xf32, #tpu.memory_space<vmem>>, vector<8x8xf32>
    %24 = arith.mulf %23, %22 : vector<8x8xf32>
    %25 = arith.addf %13, %24 : vector<8x8xf32>
    %26 = arith.mulf %23, %23 : vector<8x8xf32>
    %cst_15 = arith.constant -5.000000e-01 : f32
    %27 = vector.broadcast %cst_15 : f32 to vector<8x8xf32>
    %28 = arith.mulf %27, %26 : vector<8x8xf32>
    %29 = math.log %22 : vector<8x8xf32>
    %30 = arith.subf %28, %29 : vector<8x8xf32>
    %cst_16 = arith.constant 0.918938517 : f32
    %31 = vector.broadcast %cst_16 : f32 to vector<8x8xf32>
    %32 = arith.subf %30, %31 : vector<8x8xf32>
    %33 = math.tanh %25 : vector<8x8xf32>
    %34 = math.tanh %33 : vector<8x8xf32>
    %35 = arith.mulf %34, %34 : vector<8x8xf32>
    %cst_17 = arith.constant 1.000000e+00 : f32
    %36 = vector.broadcast %cst_17 : f32 to vector<8x8xf32>
    %37 = arith.subf %36, %35 : vector<8x8xf32>
    %cst_18 = arith.constant 1.000000e-07 : f32
    %38 = vector.broadcast %cst_18 : f32 to vector<8x8xf32>
    %39 = arith.addf %37, %38 : vector<8x8xf32>
    %40 = math.log %39 : vector<8x8xf32>
    %41 = arith.subf %32, %40 : vector<8x8xf32>
    %cst_19 = arith.constant 1.000000e+00 : f32
    %42 = vector.broadcast %cst_19 : f32 to vector<8x8xf32>
    %43 = arith.mulf %33, %42 : vector<8x8xf32>
    %44 = tpu.concatenate %43, %41 in 1 : vector<8x8xf32>, vector<8x8xf32> -> vector<8x16xf32>
    %c0_20 = arith.constant 0 : index
    %c0_21 = arith.constant 0 : index
    %45 = vector.load %arg7[%c0_20, %c0_21] : memref<8x16xf32, #tpu.memory_space<vmem>>, vector<8x16xf32>
    tpu.vector_store %arg7[%c0_20, %c0_21], %44 {strides = array<i32>} : memref<8x16xf32, #tpu.memory_space<vmem>>, vector<8x16xf32>,
    return
  }
  func.func @transform_0(%arg0: i32) -> (i32, i32) {
    %c0_i32 = arith.constant 0 : i32
    %c0_i32_0 = arith.constant 0 : i32
    return %arg0, %c0_i32 : i32, i32
  }
  func.func @transform_1(%arg0: i32) -> (i32, i32) {
    %c0_i32 = arith.constant 0 : i32
    %c0_i32_0 = arith.constant 0 : i32
    %c0_i32_1 = arith.constant 0 : i32
    return %c0_i32, %c0_i32_0 : i32, i32
  }
  func.func @transform_2(%arg0: i32) -> (i32, i32) {
    %c0_i32 = arith.constant 0 : i32
    %c0_i32_0 = arith.constant 0 : i32
    %c0_i32_1 = arith.constant 0 : i32
    return %c0_i32, %c0_i32_0 : i32, i32
  }
  func.func @transform_3(%arg0: i32) -> (i32, i32) {
    %c0_i32 = arith.constant 0 : i32
    %c0_i32_0 = arith.constant 0 : i32
    %c0_i32_1 = arith.constant 0 : i32
    return %c0_i32, %c0_i32_0 : i32, i32
  }
  func.func @transform_4(%arg0: i32) -> (i32, i32) {
    %c0_i32 = arith.constant 0 : i32
    %c0_i32_0 = arith.constant 0 : i32
    %c0_i32_1 = arith.constant 0 : i32
    return %c0_i32, %c0_i32_0 : i32, i32
  }
  func.func @transform_5(%arg0: i32) -> (i32, i32) {
    %c0_i32 = arith.constant 0 : i32
    %c0_i32_0 = arith.constant 0 : i32
    return %arg0, %c0_i32 : i32, i32
  }
  func.func @transform_6(%arg0: i32) -> (i32, i32) {
    %c0_i32 = arith.constant 0 : i32
    %c0_i32_0 = arith.constant 0 : i32
    return %arg0, %c0_i32 : i32, i32
  }
}

</mosaic_0001>

<bundles_post_ra>
// kernel: tpu_custom_call.1
= control target key start
LH: loop header
LB: loop body
LE: loop exit
PB: predicated region body
PF: predicated region fallthrough
CT: control target
= control target key end

     0   :  { %v337_v2 = vmov 0.0|0.0   ;;  %vm338_vm0 = vmmov 0   ;;  %v339_v4 = vmov 0.0   ;;  %s422_s0 = inlined_call_operand.vmem [shape: f32[8,16], index: 0, kind: input, shape index: {}]   ;;  %s423_s1 = inlined_call_operand.vmem [shape: f32[16,32], index: 1, kind: input, shape index: {}]   ;;  %s424_s2 = inlined_call_operand.vmem [shape: f32[1,32], index: 2, kind: input, shape index: {}]   ;;  %s425_s3 = inlined_call_operand.vmem [shape: f32[32,16], index: 3, kind: input, shape index: {}]   ;;  %s426_s4 = inlined_call_operand.vmem [shape: f32[1,16], index: 4, kind: input, shape index: {}]   ;;  %s427_s5 = inlined_call_operand.vmem [shape: f32[8,8], index: 5, kind: input, shape index: {}]   ;;  %s428_s6 = inlined_call_operand.hbm [shape: f32[8,16], index: 6, kind: output, shape index: {}]  }
   0x1   :  { %v25_v0 = vld [vmem:[%s423_s1] sm:$0xff]  ;;  %v26_v1 = vld [vmem:[%s423_s1 + $0x8] sm:$0xff]  ;;  %286 = vmatprep.subr.bf16.mxu0 %v337_v2  ;;  %272 = vmatprep.mubr.msk.f32.mxu0 %vm338_vm0, %v339_v4 }
   0x2   :  { %v287_v3 = vpack.c.bf16 %v26_v1, %v25_v0  ;;  %v109_v5 = vld [vmem:[%s425_s3] sm:$0xff]  ;;  %v110_v6 = vld [vmem:[%s425_s3 + $0x8] sm:$0xff]  ;;  %289 = vmatprep.subr.bf16.mxu1 %v337_v2  ;;  %283 = vmatprep.mubr.msk.f32.mxu1 %vm338_vm0, %v339_v4 }
   0x3   :  { %v290_v7 = vpack.c.bf16 %v110_v6, %v109_v5 }
   0x4   :  { %11 = vsyncpa [#allocation3], 0  ;;  %288 = vmatpush3.bf16.msra.mxu0 %v287_v3  ;;  %v24_v8 = vld [vmem:[%s422_s0] sm:$0xff]  ;;  %vm34_vm1 = vcmask 130048   ;;  %v111_v9 = vld [vmem:[%s425_s3 + $0x10] sm:$0xff]  ;;  %vm120_vm2 = vcmask 261120  }
   0x5   :  { %291 = vmatpush3.bf16.msra.mxu1 %v290_v7  ;;  %v112_v10 = vld [vmem:[%s425_s3 + $0x18] sm:$0xff]  ;;  %v255_v12 = vld [vmem:[%s424_s2] ss:$0 sm:$0xff]  ;;  %s340_s2 = smov 120   ;;  %s342_s13 = smov [#allocation2]   ;;  %vm238_vm4 = vcmask 64512  }
   0x6   :  { %292 = vmatprep.subr.bf16.mxu1 %v337_v2  ;;  %v293_v11 = vpack.c.bf16 %v112_v10, %v111_v9  ;;  %v257_v17 = vld [vmem:[%s426_s4] ss:$0 sm:$0xff]  ;;  %s247_s14 = sshll.u32 %s342_s13, 4  ;;  %s248_s14 = int_to_ptr.vmem [resolvable:$true] %s247_s14 }
   0x7   :  { %273 = vmatmul.mubr.msk.f32.vlgmr.msra.gmra.mrb[0].mxu0 %vm34_vm1, %v24_v8  ;;  %v209_v37 = vld [vmem:[%s427_s5] sm:$0xff]  ;;  %s341_s5 = smov 8   ;;  %s313_s15 = scalar_lea.vmem %s248_s14, 128 }
   0x8   :  { %v216_v46 = vmul.f32 %v209_v37, %v209_v37  ;;  %p314_p0 = scmp.ne.s32.totalorder %s248_s14, %s313_s15  ;;  %p318_p1 = scmp.lt.s32.totalorder %s248_s14, %s248_s14 }
   0x9   :  { %294 = vmatpush3.bf16.msra.mxu1 %v293_v11  ;;  %p319_p2 = scmp.lt.s32.totalorder %s313_s15, %s313_s15 }
   0xa   :  { %v217_v47 = vmul.f32 -0.5, %v216_v46 }
   0xb   :  { %p320_p3 = por %p319_p2, %p318_p1 }
   0xd   :  { %p321_p4 = pnand %p320_p3, %p314_p0 }
  0xda   :  { %v104_v13 = vpop.f32.mrb[0].mxu0 }
  0xdb   :  { %v105_v14 = vadd.f32 %v255_v12, %v104_v13  ;;  %v274_v15 = vpop.f32.mrb[1].mxu0 }
  0xdd   :  { %v108_v16 = vmax.f32 %v105_v14, 0.0 }
  0xdf   :  { %284 = vmatmul.mubr.msk.f32.vlgmr.msra.gmra.mrb[0].mxu1 %vm120_vm2, %v108_v16 }
 0x1b2   :  { %v190_v18 = vpop.f32.mrb[0].mxu1 }
 0x1b3   :  { %v191_v19 = vadd.f32 %v257_v17, %v190_v18  ;;  %v285_v20 = vpop.f32.mrb[1].mxu1 }
 0x1b5   :  { %v195_v21 = vand.u32 2147483647, %v191_v19  ;;  %v194_v32 = vmax.f32 %v191_v19, 0.0 }
 0x1b7   :  { %v196_v22 = vsub.f32 0.0, %v195_v21 }
 0x1b9   :  { %v197_v23 = vmul.f32 1.442695, %v196_v22 }
 0x1bb   :  { %301 = vpow2.f32 %v197_v23 }
 0x1c5   :  { %v302_v24 = vpop.eup %301 }
 0x1c6   :  { %v199_v25 = vadd.f32 1.0, %v302_v24  ;;  %v202_v26 = vmul.f32 -0.5, %v302_v24  ;;  %v205_v28 = vand.u32 2147483647, %v302_v24 }
 0x1c8   :  { %303 = vlog2.f32 %v199_v25  ;;  %v203_v27 = vadd.f32 1.0, %v202_v26  ;;  %vm206_vm3 = vcmp.lt.f32.partialorder %v205_v28, 0.0004427343 }
 0x1ca   :  { %v204_v31 = vmul.f32 %v302_v24, %v203_v27 }
 0x1d2   :  { %v304_v29 = vpop.eup %303 }
 0x1d3   :  { %v201_v30 = vmul.f32 0.6931472, %v304_v29 }
 0x1d5   :  { %v207_v33 = vsel %vm206_vm3, %v204_v31, %v201_v30 }
 0x1d6   :  { %v208_v34 = vadd.f32 %v207_v33, %v194_v32 }
 0x1d8   :  { %211 = vrot.lane.b32.xlu0 %v208_v34, %s340_s2  ;;  %305 = vlog2.f32 %v208_v34 }
 0x1e2   :  { %v306_v35 = vpop.eup %305 }
 0x1e3   :  { %v219_v36 = vmul.f32 0.6931472, %v306_v35 }
 0x1e5   :  { %221 = vrot.lane.b32.xlu0 %v219_v36, %s340_s2 }
 0x24a   :  { %v212_v38 = vpop.permute.xlu0 %211 }
 0x24b   :  { %v214_v39 = vmul.f32 %v212_v38, %v209_v37 }
 0x24d   :  { %v215_v40 = vadd.f32 %v214_v39, %v191_v19 }
 0x24f   :  { %307 = vtanh.f32 %v215_v40 }
 0x257   :  { %v222_v48 = vpop.permute.xlu0 %221 }
 0x258   :  { %v224_v49 = vsub.f32 %v217_v47, %v222_v48 }
 0x259   :  { %v308_v41 = vpop.eup %307 }
 0x25a   :  { %309 = vtanh.f32 %v308_v41  ;;  %v259_v51 = vadd.f32 -0.9189385, %v224_v49 }
 0x264   :  { %v310_v42 = vpop.eup %309 }
 0x265   :  { %v228_v43 = vmul.f32 %v310_v42, %v310_v42 }
 0x267   :  { %v229_v44 = vsub.f32 1.0, %v228_v43 }
 0x269   :  { %v230_v45 = vadd.f32 1e-07, %v229_v44 }
 0x26b   :  { %311 = vlog2.f32 %v230_v45 }
 0x275   :  { %v312_v50 = vpop.eup %311 }
 0x276   :  { %v232_v52 = vmul.f32 0.6931472, %v312_v50 }
 0x278   :  { %v233_v53 = vsub.f32 %v259_v51, %v232_v52 }
 0x27a   :  { %235 = vrot.lane.b32.xlu1 %v233_v53, %s341_s5 }
 0x2ec   :  { %v236_v54 = vpop.permute.xlu1 %235 }
 0x2ed   :  { %v239_v55 = vsel %vm238_vm4, %v308_v41, %v236_v54 }
 0x2ee   :  { %240 = vst.msk [vmem:[#allocation2] sm:$0xff] %vm34_vm1, %v239_v55 }
 0x2ef   :  { %324 = shalt.err (!%p321_p4)
}
 0x2f0   :  { %s325_s18 = scalar_lea.hbm %s428_s6, 128 }
 0x2f1   :  { %p326_p5 = scmp.ne.s32.totalorder %s428_s6, %s325_s18  ;;  %p329_p6 = scmp.lt.u32.totalorder %s325_s18, %s428_s6 }
 0x2f3   :  { %p331_p7 = pnand %p329_p6, %p326_p5 }
 0x2f5   :  { %334 = shalt.err (!%p331_p7)
}
 0x2f6   :  { %250 = dma.vmem_to_hbm [thread:$0]  %s248_s14, 128, %s428_s6, [#allocation3]  }
 0x2f7   :  { %335 = dma.done.wait [#allocation3], 128  }
 0x2f8   :  { %336 = vsyncadd [#allocation3], 4294967168 }
 0x2f9   :  { %254 = vsyncpa [#allocation3], 1 }

</bundles_post_ra>
